<compile_context>
chip_gen: v6e
topology: v6e:2x2x1
jax: 0.10.0
libtpu: 0.0.40
codegen_flags: <defaults>
</compile_context>

<pallas_src>
import functools

import jax
import jax.numpy as jnp
from jax.experimental import pallas as pl
from jax.experimental.pallas import tpu as pltpu


# ---------------------------------------------------------------------------
# Shared tiled matmul + bias kernel:  out = A @ W + b
# Used for both the input projection (x -> gates_x) and the output projection
# (h -> logits).  Grid = (M/tm, N/tn, K/tk), f32 accumulation in VMEM scratch,
# "parallel" on M/N tiles (megacore-shardable), "arbitrary" on the K reduction.
# ---------------------------------------------------------------------------
def matmul_bias_kernel(a_ref, w_ref, b_ref, o_ref, acc_ref):
    k = pl.program_id(2)

    @pl.when(k == 0)
    def _():
        acc_ref[...] = jnp.zeros_like(acc_ref)

    acc_ref[...] += jnp.dot(a_ref[...], w_ref[...],
                            preferred_element_type=jnp.float32)

    @pl.when(k == pl.num_programs(2) - 1)
    def _():
        o_ref[...] = (acc_ref[...] + b_ref[...]).astype(o_ref.dtype)


def _pick_tile(dim, preferred, align):
    """Largest multiple of `align` that divides `dim` and is <= preferred."""
    if dim % align != 0:
        return dim  # fall back to a full-extent block (always legal)
    t = min(preferred, dim)
    t -= t % align
    while t >= align:
        if dim % t == 0:
            return t
        t -= align
    return dim


def matmul_bias(a, w, b, *, tm=256, tn=512, tk=512):
    """out[M, N] = a[M, K] @ w[K, N] + b[1, N]   (f32, tiled Pallas matmul)."""
    M, K = a.shape
    K2, N = w.shape
    assert K == K2 and b.shape == (1, N)

    tm = _pick_tile(M, tm, 8)
    tn = _pick_tile(N, tn, 128)
    tk = _pick_tile(K, tk, 128)
    grid = (M // tm, N // tn, K // tk)

    cost = pl.CostEstimate(
        flops=2 * M * N * K,
        transcendentals=0,
        bytes_accessed=4 * (M * K + K * N + N + M * N),
    )

    return pl.pallas_call(
        matmul_bias_kernel,
        out_shape=jax.ShapeDtypeStruct((M, N), jnp.float32),
        grid_spec=pltpu.PrefetchScalarGridSpec(
            num_scalar_prefetch=0,
            grid=grid,
            in_specs=[
                pl.BlockSpec((tm, tk), lambda i, j, k: (i, k)),   # A tile
                pl.BlockSpec((tk, tn), lambda i, j, k: (k, j)),   # W tile
                pl.BlockSpec((1, tn), lambda i, j, k: (0, j)),    # bias tile
            ],
            out_specs=pl.BlockSpec((tm, tn), lambda i, j, k: (i, j)),
            scratch_shapes=[pltpu.VMEM((tm, tn), jnp.float32)],
        ),
        compiler_params=pltpu.CompilerParams(
            dimension_semantics=("parallel", "parallel", "arbitrary"),
            vmem_limit_bytes=64 * 1024 * 1024,
        ),
        cost_estimate=cost,
    )(a, w, b)


# ---------------------------------------------------------------------------
# LSTM recurrence kernel: a single invocation; lax.fori_loop over time with
# h/c carried as values.  Input gate pre-activations (x @ W_ih + b) were
# precomputed time-parallel, so each step only does h_prev @ W_hh + gates.
# ---------------------------------------------------------------------------
def lstm_recurrence_kernel(gx_ref, whh_ref, h_out_ref, *, hidden_size):
    H = hidden_size
    T, Bp, _ = gx_ref.shape

    whh = whh_ref[...]                           # (H, 4H), loaded once
    h0 = jnp.zeros((Bp, H), jnp.float32)
    c0 = jnp.zeros((Bp, H), jnp.float32)

    def step(t, carry):
        h, c = carry
        gates = gx_ref[t] + jnp.dot(h, whh, preferred_element_type=jnp.float32)
        # PyTorch LSTM gate order: [i, f, g, o].  With H a multiple of 128
        # each slice is lane-tile aligned.
        i_g = jax.nn.sigmoid(gates[:, 0 * H:1 * H])
        f_g = jax.nn.sigmoid(gates[:, 1 * H:2 * H])
        g_g = jnp.tanh(gates[:, 2 * H:3 * H])
        o_g = jax.nn.sigmoid(gates[:, 3 * H:4 * H])
        c_new = f_g * c + i_g * g_g
        h_new = o_g * jnp.tanh(c_new)
        h_out_ref[t] = h_new
        return (h_new, c_new)

    jax.lax.fori_loop(0, T, step, (h0, c0))


def lstm_recurrence(gates_x_tm, w_hh, *, hidden_size):
    T, Bp, G = gates_x_tm.shape
    H = hidden_size
    assert G == 4 * H

    cost = pl.CostEstimate(
        flops=2 * T * Bp * H * 4 * H + 10 * T * Bp * H,
        transcendentals=5 * T * Bp * H,
        bytes_accessed=4 * (T * Bp * 4 * H + H * 4 * H + T * Bp * H),
    )

    return pl.pallas_call(
        functools.partial(lstm_recurrence_kernel, hidden_size=H),
        out_shape=jax.ShapeDtypeStruct((T, Bp, H), jnp.float32),
        in_specs=[
            pl.BlockSpec(memory_space=pltpu.MemorySpace.VMEM),
            pl.BlockSpec(memory_space=pltpu.MemorySpace.VMEM),
        ],
        out_specs=pl.BlockSpec(memory_space=pltpu.MemorySpace.VMEM),
        compiler_params=pltpu.CompilerParams(
            vmem_limit_bytes=64 * 1024 * 1024,
        ),
        cost_estimate=cost,
    )(gates_x_tm, w_hh)


# ---------------------------------------------------------------------------
# Forward pass (equivalent of DecoderRNN.forward(features, captions))
# ---------------------------------------------------------------------------
def decoder_rnn_forward(params, features, captions):
    """features: (B, E) f32;  captions: (B, S) int32;  returns (B, S, V) f32."""
    emb_table = params["embed"]          # (V, E)
    w_ih = params["w_ih"]                # (E, 4H)   (pre-transposed)
    w_hh = params["w_hh"]                # (H, 4H)   (pre-transposed)
    b = params["b"]                      # (1, 4H)   (b_ih + b_hh combined)
    w_lin = params["w_lin"]              # (H, V)    (pre-transposed)
    b_lin = params["b_lin"]              # (1, V)

    B, E = features.shape
    H = w_hh.shape[0]
    V = w_lin.shape[1]
    S = captions.shape[1]
    T = S  # features step + (S-1) embedded caption tokens

    # Pad batch to a multiple of 8 (sublane) so tiles/stores are unmasked.
    Bp = max(8, ((B + 7) // 8) * 8)
    if Bp != B:
        features = jnp.pad(features, ((0, Bp - B), (0, 0)))
        captions = jnp.pad(captions, ((0, Bp - B), (0, 0)))

    # Build the LSTM input directly in time-major form (T, Bp, E):
    # step 0 = image features, steps 1..T-1 = embedded caption tokens.
    # (Only the tiny int32 token-id tensor is transposed; no activation-sized
    #  transposes, and never a vocab-sized one.)
    emb_tm = emb_table[jnp.transpose(captions[:, :-1])]             # (T-1, Bp, E)
    x_tm = jnp.concatenate([features[None, :, :], emb_tm], axis=0)  # (T, Bp, E)

    # 1) Time-parallel input projection: (T*Bp, E) @ (E, 4H) + b
    gates_x = matmul_bias(x_tm.reshape(T * Bp, E), w_ih, b)
    gates_x = gates_x.reshape(T, Bp, 4 * H)

    # 2) Serial LSTM recurrence: one kernel invocation, fori_loop over T.
    h_tm = lstm_recurrence(gates_x, w_hh, hidden_size=H)            # (T, Bp, H)

    # 3) Time-parallel output projection, batch-major: (Bp*T, H) @ (H, V) + b.
    #    The transpose is on the small H-sized tensor; the vocab-sized logits
    #    come out directly in (B, T, V) order.
    h_bm = jnp.transpose(h_tm, (1, 0, 2)).reshape(Bp * T, H)
    logits = matmul_bias(h_bm, w_lin, b_lin)                        # (Bp*T, V)
    logits = logits.reshape(Bp, T, V)
    return logits[:B]


# ---------------------------------------------------------------------------
# Pure-JAX reference of the PyTorch forward (f32, highest precision).
# ---------------------------------------------------------------------------
def decoder_rnn_reference(params, features, captions):
    emb_table = params["embed"]
    w_ih, w_hh, b = params["w_ih"], params["w_hh"], params["b"]
    w_lin, b_lin = params["w_lin"], params["b_lin"]
    H = w_hh.shape[0]
    hi = jax.lax.Precision.HIGHEST

    emb = emb_table[captions[:, :-1]]
    x = jnp.concatenate([features[:, None, :], emb], axis=1)  # (B, T, E)
    B, T, _ = x.shape

    def step(carry, x_t):
        h, c = carry
        gates = (jnp.dot(x_t, w_ih, precision=hi)
                 + jnp.dot(h, w_hh, precision=hi) + b)
        i = jax.nn.sigmoid(gates[:, 0 * H:1 * H])
        f = jax.nn.sigmoid(gates[:, 1 * H:2 * H])
        g = jnp.tanh(gates[:, 2 * H:3 * H])
        o = jax.nn.sigmoid(gates[:, 3 * H:4 * H])
        c = f * c + i * g
        h = o * jnp.tanh(c)
        return (h, c), jnp.dot(h, w_lin, precision=hi) + b_lin

    h0 = jnp.zeros((B, H), jnp.float32)
    c0 = jnp.zeros((B, H), jnp.float32)
    _, outs = jax.lax.scan(step, (h0, c0), jnp.transpose(x, (1, 0, 2)))
    return jnp.transpose(outs, (1, 0, 2))


def init_params(key, embed_size, hidden_size, vocab_size):
    ks = jax.random.split(key, 6)
    scale = 0.1
    return {
        "embed": scale * jax.random.normal(ks[0], (vocab_size, embed_size), jnp.float32),
        # Stored pre-transposed so kernels compute x @ W directly.
        "w_ih": scale * jax.random.normal(ks[1], (embed_size, 4 * hidden_size), jnp.float32),
        "w_hh": scale * jax.random.normal(ks[2], (hidden_size, 4 * hidden_size), jnp.float32),
        # Combined bias b_ih + b_hh.
        "b": scale * jax.random.normal(ks[3], (1, 4 * hidden_size), jnp.float32),
        "w_lin": scale * jax.random.normal(ks[4], (hidden_size, vocab_size), jnp.float32),
        "b_lin": scale * jax.random.normal(ks[5], (1, vocab_size), jnp.float32),
    }


if __name__ == "__main__":
    # Small, hardware-friendly shapes: H = E = 128 (lane-aligned gate slices),
    # V = 512, batch 2 (padded to 8 inside the wrapper), caption length 8.
    EMBED, HIDDEN, VOCAB = 128, 128, 512
    B, SEQ = 2, 8

    key = jax.random.PRNGKey(0)
    kp, kf, kc = jax.random.split(key, 3)

    params = init_params(kp, EMBED, HIDDEN, VOCAB)
    features = jax.random.normal(kf, (B, EMBED), jnp.float32)
    captions = jax.random.randint(kc, (B, SEQ), 0, VOCAB, dtype=jnp.int32)

    out = decoder_rnn_forward(params, features, captions)
    out = jax.block_until_ready(out)

    ref = decoder_rnn_reference(params, features, captions)
    assert out.shape == (B, SEQ, VOCAB), out.shape
    max_err = float(jnp.max(jnp.abs(out - ref)))
    assert jnp.allclose(out, ref, atol=2e-3, rtol=2e-3), (
        f"mismatch vs reference, max abs err {max_err}")

    print("KERNEL_OK")
</pallas_src>

<mosaic_0001>
module attributes {stable_mosaic.version = 11 : i64} {
  func.func @matmul_bias_kernel(%arg0: i32, %arg1: i32, %arg2: i32, %arg3: memref<64x128xf32, #tpu.memory_space<vmem>>, %arg4: memref<128x512xf32, #tpu.memory_space<vmem>>, %arg5: memref<1x512xf32, #tpu.memory_space<vmem>>, %arg6: memref<64x512xf32, #tpu.memory_space<vmem>>, %arg7: memref<64x512xf32, #tpu.memory_space<vmem>>) attributes {dimension_semantics = [#tpu.dimension_semantics<parallel>, #tpu.dimension_semantics<parallel>, #tpu.dimension_semantics<arbitrary>], iteration_bounds = array<i64: 1, 1, 1>, scalar_prefetch = 0 : i64, scratch_operands = 1 : i64, tpu.core_type = #tpu.core_type<tc>, window_params = [{transform_indices = @transform_0, window_bounds = array<i64: 64, 128>}, {transform_indices = @transform_1, window_bounds = array<i64: 128, 512>}, {transform_indices = @transform_2, window_bounds = array<i64: 1, 512>}, {transform_indices = @transform_3, window_bounds = array<i64: 64, 512>}]} {
    %c0_i32 = arith.constant 0 : i32
    %0 = arith.cmpi eq, %arg2, %c0_i32 : i32
    %1 = arith.extui %0 : i1 to i32
    %c0_i32_0 = arith.constant 0 : i32
    %2 = arith.cmpi ne, %1, %c0_i32_0 : i32
    scf.if %2 {
      %cst_10 = arith.constant 0.000000e+00 : f32
      %12 = vector.broadcast %cst_10 : f32 to vector<64x512xf32>
      %c0_11 = arith.constant 0 : index
      %c0_12 = arith.constant 0 : index
      %13 = vector.load %arg7[%c0_11, %c0_12] : memref<64x512xf32, #tpu.memory_space<vmem>>, vector<64x512xf32>
      tpu.vector_store %arg7[%c0_11, %c0_12], %12 {strides = array<i32>} : memref<64x512xf32, #tpu.memory_space<vmem>>, vector<64x512xf32>,
    } else {
    }
    %c0 = arith.constant 0 : index
    %c0_1 = arith.constant 0 : index
    %3 = vector.load %arg7[%c0, %c0_1] : memref<64x512xf32, #tpu.memory_space<vmem>>, vector<64x512xf32>
    %c0_2 = arith.constant 0 : index
    %c0_3 = arith.constant 0 : index
    %4 = vector.load %arg3[%c0_2, %c0_3] : memref<64x128xf32, #tpu.memory_space<vmem>>, vector<64x128xf32>
    %c0_4 = arith.constant 0 : index
    %c0_5 = arith.constant 0 : index
    %5 = vector.load %arg4[%c0_4, %c0_5] : memref<128x512xf32, #tpu.memory_space<vmem>>, vector<128x512xf32>
    %cst = arith.constant dense<0.000000e+00> : vector<64x512xf32>
    %6 = tpu.matmul %4, %5, %cst {dimension_numbers = #tpu.dot_dimension_numbers<[1], [0], [0], [1], [0, 0, 1, 1], [], []>} : vector<64x128xf32>, vector<128x512xf32>, vector<64x512xf32> -> vector<64x512xf32>
    %7 = arith.addf %3, %6 : vector<64x512xf32>
    %c0_6 = arith.constant 0 : index
    %c0_7 = arith.constant 0 : index
    %8 = vector.load %arg7[%c0_6, %c0_7] : memref<64x512xf32, #tpu.memory_space<vmem>>, vector<64x512xf32>
    tpu.vector_store %arg7[%c0_6, %c0_7], %7 {strides = array<i32>} : memref<64x512xf32, #tpu.memory_space<vmem>>, vector<64x512xf32>,
    %c0_i32_8 = arith.constant 0 : i32
    %9 = arith.cmpi eq, %arg2, %c0_i32_8 : i32
    %10 = arith.extui %9 : i1 to i32
    %c0_i32_9 = arith.constant 0 : i32
    %11 = arith.cmpi ne, %10, %c0_i32_9 : i32
    scf.if %11 {
      %c0_10 = arith.constant 0 : index
      %c0_11 = arith.constant 0 : index
      %12 = vector.load %arg7[%c0_10, %c0_11] : memref<64x512xf32, #tpu.memory_space<vmem>>, vector<64x512xf32>
      %c0_12 = arith.constant 0 : index
      %c0_13 = arith.constant 0 : index
      %13 = vector.load %arg5[%c0_12, %c0_13] : memref<1x512xf32, #tpu.memory_space<vmem>>, vector<1x512xf32>
      %14 = vector.broadcast %13 : vector<1x512xf32> to vector<64x512xf32>
      %15 = arith.addf %12, %14 : vector<64x512xf32>
      %c0_14 = arith.constant 0 : index
      %c0_15 = arith.constant 0 : index
      %16 = vector.load %arg6[%c0_14, %c0_15] : memref<64x512xf32, #tpu.memory_space<vmem>>, vector<64x512xf32>
      tpu.vector_store %arg6[%c0_14, %c0_15], %15 {strides = array<i32>} : memref<64x512xf32, #tpu.memory_space<vmem>>, vector<64x512xf32>,
    } else {
    }
    return
  }
  func.func @transform_0(%arg0: i32, %arg1: i32, %arg2: i32) -> (i32, i32) {
    %c0_i32 = arith.constant 0 : i32
    return %arg0, %arg2 : i32, i32
  }
  func.func @transform_1(%arg0: i32, %arg1: i32, %arg2: i32) -> (i32, i32) {
    %c0_i32 = arith.constant 0 : i32
    return %arg2, %arg1 : i32, i32
  }
  func.func @transform_2(%arg0: i32, %arg1: i32, %arg2: i32) -> (i32, i32) {
    %c0_i32 = arith.constant 0 : i32
    %c0_i32_0 = arith.constant 0 : i32
    return %c0_i32, %arg1 : i32, i32
  }
  func.func @transform_3(%arg0: i32, %arg1: i32, %arg2: i32) -> (i32, i32) {
    %c0_i32 = arith.constant 0 : i32
    return %arg0, %arg1 : i32, i32
  }
}

</mosaic_0001>

<bundles_post_ra>
// kernel: tpu_custom_call.1
= control target key start
LH: loop header
LB: loop body
LE: loop exit
PB: predicated region body
PF: predicated region fallthrough
CT: control target
= control target key end

     0   :  { %8 = vsyncpa [#allocation4], 0  ;;  %s821_s0 = inlined_call_operand.hbm [shape: f32[64,128], index: 0, kind: input, shape index: {}]   ;;  %s822_s1 = inlined_call_operand.hbm [shape: f32[128,512], index: 1, kind: input, shape index: {}]   ;;  %s823_s2 = inlined_call_operand.hbm [shape: f32[1,512], index: 2, kind: input, shape index: {}]   ;;  %s824_s3 = inlined_call_operand.hbm [shape: f32[64,512], index: 3, kind: output, shape index: {}]  }
   0x1   :  { %9 = vsyncpa [#allocation7], 0 }
   0x2   :  { %10 = vsyncpa [#allocation5], 0  ;;  %s718_s12 = smov [#allocation6]  }
   0x3   :  { %s28_s13 = sshll.u32 %s718_s12, 4  ;;  %s29_s13 = int_to_ptr.vmem [resolvable:$true] %s28_s13 }
   0x4   :  { %s640_s14 = scalar_lea.vmem %s29_s13, 8192  ;;  %p645_p1 = scmp.lt.s32.totalorder %s29_s13, %s29_s13 }
   0x5   :  { %p641_p0 = scmp.ne.s32.totalorder %s29_s13, %s640_s14  ;;  %p646_p2 = scmp.lt.s32.totalorder %s640_s14, %s640_s14 }
   0x7   :  { %p647_p3 = por %p646_p2, %p645_p1 }
   0x9   :  { %p648_p4 = pnand %p647_p3, %p641_p0 }
   0xb   :  { %651 = shalt.err (!%p648_p4)
}
   0xc   :  { %s719_s15 = smov 512   ;;  %s720_s16 = smov 32  }
   0xd   :  { %34 = dma.hbm_to_vmem [thread:$0]  %s822_s1, 8192, %s29_s13, [#allocation7], %s719_s15, %s719_s15, %s720_s16  }
   0xe   :  { %s721_s19 = smov [#allocation3]  }
   0xf   :  { %s16_s20 = sshll.u32 %s721_s19, 4  ;;  %s17_s20 = int_to_ptr.vmem [resolvable:$true] %s16_s20 }
  0x10   :  { %s660_s21 = scalar_lea.vmem %s17_s20, 1024  ;;  %p665_p6 = scmp.lt.s32.totalorder %s17_s20, %s17_s20 }
  0x11   :  { %p661_p5 = scmp.ne.s32.totalorder %s17_s20, %s660_s21  ;;  %p666_p7 = scmp.lt.s32.totalorder %s660_s21, %s660_s21 }
  0x13   :  { %p667_p8 = por %p666_p7, %p665_p6 }
  0x15   :  { %p668_p9 = pnand %p667_p8, %p661_p5 }
  0x17   :  { %671 = shalt.err (!%p668_p9)
}
  0x18   :  { %s722_s22 = smov 128   ;;  %s723_s23 = smov 8  }
  0x19   :  { %22 = dma.hbm_to_vmem [thread:$0]  %s821_s0, 1024, %s17_s20, [#allocation4], %s722_s22, %s722_s22, %s723_s23  }
  0x1a   :  { %s724_s26 = smov [#allocation8]  }
  0x1b   :  { %s41_s27 = sshll.u32 %s724_s26, 4  ;;  %s42_s27 = int_to_ptr.vmem [resolvable:$true] %s41_s27 }
  0x1c   :  { %s680_s1 = scalar_lea.vmem %s42_s27, 64  ;;  %p685_p11 = scmp.lt.s32.totalorder %s42_s27, %s42_s27 }
  0x1d   :  { %p681_p10 = scmp.ne.s32.totalorder %s42_s27, %s680_s1  ;;  %p686_p12 = scmp.lt.s32.totalorder %s680_s1, %s680_s1 }
  0x1f   :  { %p687_p13 = por %p686_p12, %p685_p11 }
  0x21   :  { %p688_p0 = pnand %p687_p13, %p681_p10 }
  0x23   :  { %691 = shalt.err (!%p688_p0)
}
  0x24   :  { %44 = dma.hbm_to_vmem [thread:$0]  %s823_s2, 64, %s42_s27, [#allocation7]  }
  0x25   :  { %712 = dma.done.wait [#allocation4], 1024  }
  0x26   :  { %713 = vsyncadd [#allocation4], 4294966272 }
  0x27   :  { %714 = dma.done.wait [#allocation7], 8256  }
  0x28   :  { %715 = vsyncadd [#allocation7], 4294959040  ;;  %v725_v0 = vmov 0.0   ;;  %v191_v1 = vld [vmem:[#allocation6 + $0x1e8] sm:$0xff]  ;;  %v193_v2 = vld [vmem:[#allocation6 + $0x1f8] sm:$0xff]  ;;  %s726_s0 = smov [#allocation9]  }
  0x29   :  { %258 = vmatprep.mubr.f32.mxu0 %v725_v0  ;;  %371 = vmatprep.mubr.f32.mxu1 %v725_v0  ;;  %v190_v3 = vld [vmem:[#allocation6 + $0x1e0] sm:$0xff]  ;;  %v192_v4 = vld [vmem:[#allocation6 + $0x1f0] sm:$0xff]  ;;  %v187_v5 = vld [vmem:[#allocation6 + $0x1c8] sm:$0xff]  ;;  %s610_s2 = sshll.u32 %s726_s0, 4  ;;  %s611_s2 = int_to_ptr.vmem [resolvable:$true] %s610_s2 }
  0x2a   :  { %194 = vmatprep.subr.mxu0 %v191_v1  ;;  %307 = vmatprep.subr.mxu1 %v193_v2  ;;  %v189_v6 = vld [vmem:[#allocation6 + $0x1d8] sm:$0xff]  ;;  %v186_v7 = vld [vmem:[#allocation6 + $0x1c0] sm:$0xff]  ;;  %v188_v8 = vld [vmem:[#allocation6 + $0x1d0] sm:$0xff]  ;;  %s692_s30 = scalar_lea.vmem %s611_s2, 4096  ;;  %p697_p2 = scmp.lt.s32.totalorder %s611_s2, %s611_s2 }
  0x2b   :  { %195 = vmatpush1.msra.mxu0 %v190_v3  ;;  %308 = vmatpush1.msra.mxu1 %v192_v4  ;;  %v183_v9 = vld [vmem:[#allocation6 + $0x1a8] sm:$0xff]  ;;  %v185_v10 = vld [vmem:[#allocation6 + $0x1b8] sm:$0xff]  ;;  %v182_v11 = vld [vmem:[#allocation6 + $0x1a0] sm:$0xff]  ;;  %p693_p1 = scmp.ne.s32.totalorder %s611_s2, %s692_s30  ;;  %p698_p3 = scmp.lt.s32.totalorder %s692_s30, %s692_s30 }
  0x2c   :  { %196 = vmatprep.subr.mxu0 %v187_v5  ;;  %309 = vmatprep.subr.mxu1 %v189_v6  ;;  %v184_v12 = vld [vmem:[#allocation6 + $0x1b0] sm:$0xff]  ;;  %v179_v13 = vld [vmem:[#allocation6 + $0x188] sm:$0xff]  ;;  %v181_v14 = vld [vmem:[#allocation6 + $0x198] sm:$0xff] }
  0x2d   :  { %197 = vmatpush1.msra.mxu0 %v186_v7  ;;  %310 = vmatpush1.msra.mxu1 %v188_v8  ;;  %v178_v15 = vld [vmem:[#allocation6 + $0x180] sm:$0xff]  ;;  %v180_v16 = vld [vmem:[#allocation6 + $0x190] sm:$0xff]  ;;  %v175_v17 = vld [vmem:[#allocation6 + $0x168] sm:$0xff]  ;;  %p699_p4 = por %p698_p3, %p697_p2 }
  0x2e   :  { %198 = vmatprep.subr.mxu0 %v183_v9  ;;  %311 = vmatprep.subr.mxu1 %v185_v10  ;;  %v177_v18 = vld [vmem:[#allocation6 + $0x178] sm:$0xff]  ;;  %v174_v19 = vld [vmem:[#allocation6 + $0x160] sm:$0xff]  ;;  %v176_v20 = vld [vmem:[#allocation6 + $0x170] sm:$0xff]  ;;  %v521_v10 = vlaneseq }
  0x2f   :  { %199 = vmatpush1.msra.mxu0 %v182_v11  ;;  %312 = vmatpush1.msra.mxu1 %v184_v12  ;;  %v171_v21 = vld [vmem:[#allocation6 + $0x148] sm:$0xff]  ;;  %v173_v22 = vld [vmem:[#allocation6 + $0x158] sm:$0xff]  ;;  %v170_v23 = vld [vmem:[#allocation6 + $0x140] sm:$0xff]  ;;  %p700_p5 = pnand %p699_p4, %p693_p1 }
  0x30   :  { %200 = vmatprep.subr.mxu0 %v179_v13  ;;  %313 = vmatprep.subr.mxu1 %v181_v14  ;;  %v172_v24 = vld [vmem:[#allocation6 + $0x150] sm:$0xff]  ;;  %v167_v25 = vld [vmem:[#allocation6 + $0x128] sm:$0xff]  ;;  %v169_v26 = vld [vmem:[#allocation6 + $0x138] sm:$0xff]  ;;  %v522_v11 = vshrl.u32 %v521_v10, 7 }
  0x31   :  { %201 = vmatpush1.msra.mxu0 %v178_v15  ;;  %314 = vmatpush1.msra.mxu1 %v180_v16  ;;  %v166_v27 = vld [vmem:[#allocation6 + $0x120] sm:$0xff]  ;;  %v168_v28 = vld [vmem:[#allocation6 + $0x130] sm:$0xff]  ;;  %v163_v29 = vld [vmem:[#allocation6 + $0x108] sm:$0xff] }
  0x32   :  { %202 = vmatprep.subr.mxu0 %v175_v17  ;;  %315 = vmatprep.subr.mxu1 %v177_v18  ;;  %v165_v30 = vld [vmem:[#allocation6 + $0x118] sm:$0xff]  ;;  %v162_v31 = vld [vmem:[#allocation6 + $0x100] sm:$0xff]  ;;  %v164_v32 = vld [vmem:[#allocation6 + $0x110] sm:$0xff]  ;;  %v523_v12 = vsub.s32 0, %v522_v11  ;;  %v531_v13 = vsub.s32 2, %v522_v11  ;;  %v527_v15 = vsub.s32 1, %v522_v11 }
  0x33   :  { %203 = vmatpush1.msra.mxu0 %v174_v19  ;;  %316 = vmatpush1.msra.mxu1 %v176_v20  ;;  %v159_v33 = vld [vmem:[#allocation6 + $0xe8] sm:$0xff]  ;;  %v161_v34 = vld [vmem:[#allocation6 + $0xf8] sm:$0xff]  ;;  %v158_v35 = vld [vmem:[#allocation6 + $0xe0] sm:$0xff]  ;;  %v535_v16 = vsub.s32 3, %v522_v11 }
  0x34   :  { %204 = vmatprep.subr.mxu0 %v171_v21  ;;  %317 = vmatprep.subr.mxu1 %v173_v22  ;;  %v160_v36 = vld [vmem:[#allocation6 + $0xf0] sm:$0xff]  ;;  %v155_v37 = vld [vmem:[#allocation6 + $0xc8] sm:$0xff]  ;;  %v157_v38 = vld [vmem:[#allocation6 + $0xd8] sm:$0xff] }
  0x35   :  { %205 = vmatpush1.msra.mxu0 %v170_v23  ;;  %318 = vmatpush1.msra.mxu1 %v172_v24  ;;  %v154_v39 = vld [vmem:[#allocation6 + $0xc0] sm:$0xff]  ;;  %v156_v40 = vld [vmem:[#allocation6 + $0xd0] sm:$0xff]  ;;  %v151_v41 = vld [vmem:[#allocation6 + $0xa8] sm:$0xff] }
  0x36   :  { %206 = vmatprep.subr.mxu0 %v167_v25  ;;  %319 = vmatprep.subr.mxu1 %v169_v26  ;;  %v153_v42 = vld [vmem:[#allocation6 + $0xb8] sm:$0xff]  ;;  %v150_v43 = vld [vmem:[#allocation6 + $0xa0] sm:$0xff]  ;;  %v152_v44 = vld [vmem:[#allocation6 + $0xb0] sm:$0xff] }
  0x37   :  { %207 = vmatpush1.msra.mxu0 %v166_v27  ;;  %320 = vmatpush1.msra.mxu1 %v168_v28  ;;  %v147_v45 = vld [vmem:[#allocation6 + $0x88] sm:$0xff]  ;;  %v149_v46 = vld [vmem:[#allocation6 + $0x98] sm:$0xff]  ;;  %v146_v47 = vld [vmem:[#allocation6 + $0x80] sm:$0xff] }
  0x38   :  { %208 = vmatprep.subr.mxu0 %v163_v29  ;;  %321 = vmatprep.subr.mxu1 %v165_v30  ;;  %v148_v48 = vld [vmem:[#allocation6 + $0x90] sm:$0xff]  ;;  %v143_v49 = vld [vmem:[#allocation6 + $0x68] sm:$0xff]  ;;  %v145_v50 = vld [vmem:[#allocation6 + $0x78] sm:$0xff] }
  0x39   :  { %209 = vmatpush1.msra.mxu0 %v162_v31  ;;  %322 = vmatpush1.msra.mxu1 %v164_v32  ;;  %v142_v51 = vld [vmem:[#allocation6 + $0x60] sm:$0xff]  ;;  %v144_v52 = vld [vmem:[#allocation6 + $0x70] sm:$0xff]  ;;  %v139_v53 = vld [vmem:[#allocation6 + $0x48] sm:$0xff] }
  0x3a   :  { %210 = vmatprep.subr.mxu0 %v159_v33  ;;  %323 = vmatprep.subr.mxu1 %v161_v34  ;;  %v141_v54 = vld [vmem:[#allocation6 + $0x58] sm:$0xff]  ;;  %v138_v55 = vld [vmem:[#allocation6 + $0x40] sm:$0xff]  ;;  %v140_v56 = vld [vmem:[#allocation6 + $0x50] sm:$0xff] }
  0x3b   :  { %211 = vmatpush1.msra.mxu0 %v158_v35  ;;  %324 = vmatpush1.msra.mxu1 %v160_v36  ;;  %v135_v57 = vld [vmem:[#allocation6 + $0x28] sm:$0xff]  ;;  %v137_v58 = vld [vmem:[#allocation6 + $0x38] sm:$0xff]  ;;  %v134_v59 = vld [vmem:[#allocation6 + $0x20] sm:$0xff] }
  0x3c   :  { %212 = vmatprep.subr.mxu0 %v155_v37  ;;  %325 = vmatprep.subr.mxu1 %v157_v38  ;;  %v136_v60 = vld [vmem:[#allocation6 + $0x30] sm:$0xff]  ;;  %v131_v61 = vld [vmem:[#allocation6 + $0x8] sm:$0xff]  ;;  %v133_v62 = vld [vmem:[#allocation6 + $0x18] sm:$0xff] }
  0x3d   :  { %213 = vmatpush1.msra.mxu0 %v154_v39  ;;  %326 = vmatpush1.msra.mxu1 %v156_v40  ;;  %v130_v63 = vld [vmem:[#allocation6] sm:$0xff]  ;;  %v132_v1 = vld [vmem:[#allocation6 + $0x10] sm:$0xff]  ;;  %v123_v3 = vld [vmem:[#allocation3 + $0x8] sm:$0xff] }
  0x3e   :  { %214 = vmatprep.subr.mxu0 %v151_v41  ;;  %327 = vmatprep.subr.mxu1 %v153_v42  ;;  %v122_v2 = vld [vmem:[#allocation3] sm:$0xff]  ;;  %v124_v4 = vld [vmem:[#allocation3 + $0x10] sm:$0xff]  ;;  %v125_v5 = vld [vmem:[#allocation3 + $0x18] sm:$0xff] }
  0x3f   :  { %215 = vmatpush1.msra.mxu0 %v150_v43  ;;  %328 = vmatpush1.msra.mxu1 %v152_v44  ;;  %v126_v6 = vld [vmem:[#allocation3 + $0x20] sm:$0xff]  ;;  %v127_v7 = vld [vmem:[#allocation3 + $0x28] sm:$0xff]  ;;  %v128_v8 = vld [vmem:[#allocation3 + $0x30] sm:$0xff] }
  0x40   :  { %216 = vmatprep.subr.mxu0 %v147_v45  ;;  %329 = vmatprep.subr.mxu1 %v149_v46  ;;  %v129_v9 = vld [vmem:[#allocation3 + $0x38] sm:$0xff]  ;;  %v519_v14 = vld [vmem:[#allocation8] sm:$0xf] }
  0x41   :  { %217 = vmatpush1.msra.mxu0 %v146_v47  ;;  %330 = vmatpush1.msra.mxu1 %v148_v48  ;;  %v775_v17 = vrot.slane %v519_v14, %v523_v12  ;;  %v777_v18 = vrot.slane %v519_v14, %v531_v13  ;;  %v779_v19 = vrot.slane %v519_v14, %v527_v15 }
  0x42   :  { %218 = vmatprep.subr.mxu0 %v143_v49  ;;  %331 = vmatprep.subr.mxu1 %v145_v50  ;;  %v781_v20 = vrot.slane %v519_v14, %v535_v16 }
  0x43   :  { %219 = vmatpush1.msra.mxu0 %v142_v51  ;;  %332 = vmatpush1.msra.mxu1 %v144_v52 }
  0x44   :  { %220 = vmatprep.subr.mxu0 %v139_v53  ;;  %333 = vmatprep.subr.mxu1 %v141_v54 }
  0x45   :  { %221 = vmatpush1.msra.mxu0 %v138_v55  ;;  %334 = vmatpush1.msra.mxu1 %v140_v56 }
  0x46   :  { %222 = vmatprep.subr.mxu0 %v135_v57  ;;  %335 = vmatprep.subr.mxu1 %v137_v58 }
  0x47   :  { %223 = vmatpush1.msra.mxu0 %v134_v59  ;;  %336 = vmatpush1.msra.mxu1 %v136_v60 }
  0x48   :  { %224 = vmatprep.subr.mxu0 %v131_v61  ;;  %337 = vmatprep.subr.mxu1 %v133_v62 }
  0x49   :  { %225 = vmatpush1.msra.mxu0 %v130_v63  ;;  %338 = vmatpush1.msra.mxu1 %v132_v1 }
  0x4a   :  { %259 = vmatmul.mubr.f32.vlgmr.msra.gmra.mxu0 %v122_v2  ;;  %372 = vmatmul.mubr.f32.vlgmr.msra.gmra.mxu1 %v122_v2 }
  0x4b   :  { %264 = vmatprep.mubr.f32.mxu0 %v725_v0  ;;  %377 = vmatprep.mubr.f32.mxu1 %v725_v0 }
  0x4e   :  { %265 = vmatmul.mubr.f32.gmra.mxu0 %v123_v3  ;;  %378 = vmatmul.mubr.f32.gmra.mxu1 %v123_v3 }
  0x4f   :  { %270 = vmatprep.mubr.f32.mxu0 %v725_v0  ;;  %383 = vmatprep.mubr.f32.mxu1 %v725_v0 }
  0x52   :  { %271 = vmatmul.mubr.f32.gmra.mxu0 %v124_v4  ;;  %384 = vmatmul.mubr.f32.gmra.mxu1 %v124_v4 }
  0x53   :  { %276 = vmatprep.mubr.f32.mxu0 %v725_v0  ;;  %389 = vmatprep.mubr.f32.mxu1 %v725_v0 }
  0x56   :  { %277 = vmatmul.mubr.f32.gmra.mxu0 %v125_v5  ;;  %390 = vmatmul.mubr.f32.gmra.mxu1 %v125_v5 }
  0x57   :  { %282 = vmatprep.mubr.f32.mxu0 %v725_v0  ;;  %395 = vmatprep.mubr.f32.mxu1 %v725_v0 }
  0x5a   :  { %283 = vmatmul.mubr.f32.gmra.mxu0 %v126_v6  ;;  %396 = vmatmul.mubr.f32.gmra.mxu1 %v126_v6 }
  0x5b   :  { %288 = vmatprep.mubr.f32.mxu0 %v725_v0  ;;  %401 = vmatprep.mubr.f32.mxu1 %v725_v0 }
  0x5e   :  { %289 = vmatmul.mubr.f32.gmra.mxu0 %v127_v7  ;;  %402 = vmatmul.mubr.f32.gmra.mxu1 %v127_v7 }
  0x5f   :  { %294 = vmatprep.mubr.f32.mxu0 %v725_v0  ;;  %407 = vmatprep.mubr.f32.mxu1 %v725_v0 }
  0x62   :  { %295 = vmatmul.mubr.f32.gmra.mxu0 %v128_v8  ;;  %408 = vmatmul.mubr.f32.gmra.mxu1 %v128_v8 }
  0x63   :  { %300 = vmatprep.mubr.f32.mxu0 %v725_v0  ;;  %413 = vmatprep.mubr.f32.mxu1 %v725_v0 }
  0x66   :  { %301 = vmatmul.mubr.f32.gmra.mxu0 %v129_v9  ;;  %414 = vmatmul.mubr.f32.gmra.mxu1 %v129_v9 }
 0x10a   :  { %v260_v21 = vpop.f32.mrf.mxu0  ;;  %v373_v0 = vpop.f32.mrf.mxu1 }
 0x10b   :  { %v541_v22 = vadd.f32 %v775_v17, %v260_v21  ;;  %v543_v23 = vadd.f32 %v777_v18, %v373_v0 }
 0x10c   :  { %v262_v24 = vpop.f32.mrf.mxu0  ;;  %v375_v25 = vpop.f32.mrf.mxu1 }
 0x10d   :  { %573 = vst [vmem:[#allocation9] sm:$0xff] %v541_v22  ;;  %575 = vst [vmem:[#allocation9 + $0x10] sm:$0xff] %v543_v23  ;;  %v542_v26 = vadd.f32 %v779_v19, %v262_v24  ;;  %v544_v27 = vadd.f32 %v781_v20, %v375_v25 }
 0x10e   :  { %v266_v28 = vpop.f32.mrf.mxu0  ;;  %v379_v29 = vpop.f32.mrf.mxu1 }
 0x10f   :  { %574 = vst [vmem:[#allocation9 + $0x8] sm:$0xff] %v542_v26  ;;  %576 = vst [vmem:[#allocation9 + $0x18] sm:$0xff] %v544_v27  ;;  %v545_v30 = vadd.f32 %v775_v17, %v266_v28  ;;  %v547_v31 = vadd.f32 %v777_v18, %v379_v29 }
 0x110   :  { %v268_v32 = vpop.f32.mrf.mxu0  ;;  %v381_v33 = vpop.f32.mrf.mxu1 }
 0x111   :  { %577 = vst [vmem:[#allocation9 + $0x20] sm:$0xff] %v545_v30  ;;  %579 = vst [vmem:[#allocation9 + $0x30] sm:$0xff] %v547_v31  ;;  %v546_v34 = vadd.f32 %v779_v19, %v268_v32  ;;  %v548_v35 = vadd.f32 %v781_v20, %v381_v33 }
 0x112   :  { %v272_v36 = vpop.f32.mrf.mxu0  ;;  %v385_v37 = vpop.f32.mrf.mxu1 }
 0x113   :  { %578 = vst [vmem:[#allocation9 + $0x28] sm:$0xff] %v546_v34  ;;  %580 = vst [vmem:[#allocation9 + $0x38] sm:$0xff] %v548_v35  ;;  %v549_v38 = vadd.f32 %v775_v17, %v272_v36  ;;  %v551_v39 = vadd.f32 %v777_v18, %v385_v37 }
 0x114   :  { %v274_v40 = vpop.f32.mrf.mxu0  ;;  %v387_v41 = vpop.f32.mrf.mxu1 }
 0x115   :  { %581 = vst [vmem:[#allocation9 + $0x40] sm:$0xff] %v549_v38  ;;  %583 = vst [vmem:[#allocation9 + $0x50] sm:$0xff] %v551_v39  ;;  %v550_v42 = vadd.f32 %v779_v19, %v274_v40  ;;  %v552_v43 = vadd.f32 %v781_v20, %v387_v41 }
 0x116   :  { %v278_v44 = vpop.f32.mrf.mxu0  ;;  %v391_v45 = vpop.f32.mrf.mxu1 }
 0x117   :  { %582 = vst [vmem:[#allocation9 + $0x48] sm:$0xff] %v550_v42  ;;  %584 = vst [vmem:[#allocation9 + $0x58] sm:$0xff] %v552_v43  ;;  %v553_v46 = vadd.f32 %v775_v17, %v278_v44  ;;  %v555_v47 = vadd.f32 %v777_v18, %v391_v45 }
 0x118   :  { %v280_v48 = vpop.f32.mrf.mxu0  ;;  %v393_v49 = vpop.f32.mrf.mxu1 }
 0x119   :  { %585 = vst [vmem:[#allocation9 + $0x60] sm:$0xff] %v553_v46  ;;  %587 = vst [vmem:[#allocation9 + $0x70] sm:$0xff] %v555_v47  ;;  %v554_v50 = vadd.f32 %v779_v19, %v280_v48  ;;  %v556_v51 = vadd.f32 %v781_v20, %v393_v49 }
 0x11a   :  { %v284_v52 = vpop.f32.mrf.mxu0  ;;  %v397_v53 = vpop.f32.mrf.mxu1 }
 0x11b   :  { %586 = vst [vmem:[#allocation9 + $0x68] sm:$0xff] %v554_v50  ;;  %588 = vst [vmem:[#allocation9 + $0x78] sm:$0xff] %v556_v51  ;;  %v557_v54 = vadd.f32 %v775_v17, %v284_v52  ;;  %v559_v55 = vadd.f32 %v777_v18, %v397_v53 }
 0x11c   :  { %v286_v56 = vpop.f32.mrf.mxu0  ;;  %v399_v57 = vpop.f32.mrf.mxu1 }
 0x11d   :  { %589 = vst [vmem:[#allocation9 + $0x80] sm:$0xff] %v557_v54  ;;  %591 = vst [vmem:[#allocation9 + $0x90] sm:$0xff] %v559_v55  ;;  %v558_v58 = vadd.f32 %v779_v19, %v286_v56  ;;  %v560_v59 = vadd.f32 %v781_v20, %v399_v57 }
 0x11e   :  { %v290_v60 = vpop.f32.mrf.mxu0  ;;  %v403_v61 = vpop.f32.mrf.mxu1 }
 0x11f   :  { %590 = vst [vmem:[#allocation9 + $0x88] sm:$0xff] %v558_v58  ;;  %592 = vst [vmem:[#allocation9 + $0x98] sm:$0xff] %v560_v59  ;;  %v561_v62 = vadd.f32 %v775_v17, %v290_v60  ;;  %v563_v63 = vadd.f32 %v777_v18, %v403_v61 }
 0x120   :  { %v292_v1 = vpop.f32.mrf.mxu0  ;;  %v405_v2 = vpop.f32.mrf.mxu1 }
 0x121   :  { %593 = vst [vmem:[#allocation9 + $0xa0] sm:$0xff] %v561_v62  ;;  %595 = vst [vmem:[#allocation9 + $0xb0] sm:$0xff] %v563_v63  ;;  %v562_v3 = vadd.f32 %v779_v19, %v292_v1  ;;  %v564_v4 = vadd.f32 %v781_v20, %v405_v2 }
 0x122   :  { %v296_v5 = vpop.f32.mrf.mxu0  ;;  %v409_v6 = vpop.f32.mrf.mxu1 }
 0x123   :  { %594 = vst [vmem:[#allocation9 + $0xa8] sm:$0xff] %v562_v3  ;;  %596 = vst [vmem:[#allocation9 + $0xb8] sm:$0xff] %v564_v4  ;;  %v565_v7 = vadd.f32 %v775_v17, %v296_v5  ;;  %v567_v8 = vadd.f32 %v777_v18, %v409_v6 }
 0x124   :  { %v298_v9 = vpop.f32.mrf.mxu0  ;;  %v411_v10 = vpop.f32.mrf.mxu1 }
 0x125   :  { %597 = vst [vmem:[#allocation9 + $0xc0] sm:$0xff] %v565_v7  ;;  %599 = vst [vmem:[#allocation9 + $0xd0] sm:$0xff] %v567_v8  ;;  %v566_v11 = vadd.f32 %v779_v19, %v298_v9  ;;  %v568_v12 = vadd.f32 %v781_v20, %v411_v10 }
 0x126   :  { %v302_v13 = vpop.f32.mrf.mxu0  ;;  %v415_v14 = vpop.f32.mrf.mxu1 }
 0x127   :  { %598 = vst [vmem:[#allocation9 + $0xc8] sm:$0xff] %v566_v11  ;;  %600 = vst [vmem:[#allocation9 + $0xd8] sm:$0xff] %v568_v12  ;;  %v569_v15 = vadd.f32 %v775_v17, %v302_v13  ;;  %v571_v16 = vadd.f32 %v777_v18, %v415_v14 }
 0x128   :  { %v304_v21 = vpop.f32.mrf.mxu0  ;;  %v417_v0 = vpop.f32.mrf.mxu1 }
 0x129   :  { %601 = vst [vmem:[#allocation9 + $0xe0] sm:$0xff] %v569_v15  ;;  %603 = vst [vmem:[#allocation9 + $0xf0] sm:$0xff] %v571_v16  ;;  %v570_v22 = vadd.f32 %v779_v19, %v304_v21  ;;  %v572_v23 = vadd.f32 %v781_v20, %v417_v0 }
 0x12b   :  { %602 = vst [vmem:[#allocation9 + $0xe8] sm:$0xff] %v570_v22  ;;  %604 = vst [vmem:[#allocation9 + $0xf8] sm:$0xff] %v572_v23 }
 0x12c   :  { %703 = shalt.err (!%p700_p5)
}
 0x12d   :  { %616 = dma.vmem_to_hbm [thread:$0]  %s611_s2, 4096, %s824_s3, [#allocation5], %s719_s15, %s719_s15, %s720_s16  }
 0x12e   :  { %716 = dma.done.wait [#allocation5], 4096  }
 0x12f   :  { %717 = vsyncadd [#allocation5], 4294963200 }
 0x130   :  { %620 = vsyncpa [#allocation4], 1 }
 0x131   :  { %621 = vsyncpa [#allocation7], 1 }
 0x132   :  { %622 = vsyncpa [#allocation5], 1 }

</bundles_post_ra>
